<compile_context>
chip_gen: v6e
topology: v6e:2x2x1
jax: 0.10.0
libtpu: 0.0.40
codegen_flags: <defaults>
</compile_context>

<pallas_src>
import functools

import jax
import jax.numpy as jnp
from jax.experimental import pallas as pl
from jax.experimental.pallas import tpu as pltpu

HIDDEN = 128   # hidden width of the MLP (nn.Linear(input_dim, 128))
LANE = 128     # TPU lane width; the output head is zero-padded to this


def _round_up(n, m):
    return (n + m - 1) // m * m


def dqn_kernel(x_ref, w1_ref, b1_ref, w2_ref, b2_ref, o_ref):
    # Layer 1: (Bt, D_in)bf16 @ (D_in, 128)bf16 on the MXU, f32 accumulation.
    h = jnp.dot(x_ref[...], w1_ref[...], preferred_element_type=jnp.float32)
    h = jnp.maximum(h + b1_ref[...], 0.0)                 # bias + ReLU in f32
    # Layer 2: cast activations to bf16 for the MXU, accumulate in f32.
    y = jnp.dot(h.astype(w2_ref.dtype), w2_ref[...],
                preferred_element_type=jnp.float32)
    # Lane-dense (Bt, 128) store; real D_out columns are sliced by the wrapper.
    o_ref[...] = (y + b2_ref[...]).astype(o_ref.dtype)


@functools.partial(jax.jit, static_argnames=("block_b",))
def dqn_forward(x, w1, b1, w2, b2, *, block_b=256):
    """relu(x @ w1 + b1) @ w2 + b2.

    x : (B, D_in) f32
    w1: (D_in, 128), b1: (1, 128), w2: (128, D_out), b2: (1, D_out)
    Weights are stored pre-transposed ((in, out)) relative to torch.nn.Linear.
    """
    B, d_in = x.shape
    d_out = w2.shape[1]

    # Batch tile: multiple of 8 sublanes, capped (vreg pressure / v7x VMEM budget),
    # shrunk for tiny batches so we don't pad 8 rows up to 256.
    bt = min(_round_up(block_b, 8), _round_up(B, 8))
    b_pad = _round_up(B, bt)
    grid = (b_pad // bt,)

    # bf16 inputs/weights for the MXU; f32 biases (added after f32 accumulation).
    x_p = jnp.pad(x, ((0, b_pad - B), (0, 0))).astype(jnp.bfloat16)
    w1_b = w1.astype(jnp.bfloat16)
    b1_f = b1.astype(jnp.float32)
    # Zero-pad the output head to a full 128-lane width (dense vector stores).
    w2_b = jnp.pad(w2, ((0, 0), (0, LANE - d_out))).astype(jnp.bfloat16)
    b2_f = jnp.pad(b2, ((0, 0), (0, LANE - d_out))).astype(jnp.float32)

    flops = 2 * b_pad * (d_in * HIDDEN + HIDDEN * LANE)
    bytes_accessed = (x_p.size * 2 + w1_b.size * 2 + b1_f.size * 4
                      + w2_b.size * 2 + b2_f.size * 4 + b_pad * LANE * 4)

    out = pl.pallas_call(
        dqn_kernel,
        out_shape=jax.ShapeDtypeStruct((b_pad, LANE), jnp.float32),
        grid=grid,
        in_specs=[
            # x: tiled over the batch grid axis (pipelined).
            pl.BlockSpec((bt, d_in), lambda i: (i, 0)),
            # Weights / biases: tiny, stay resident (same block for every i).
            pl.BlockSpec((d_in, HIDDEN), lambda i: (0, 0)),
            pl.BlockSpec((1, HIDDEN), lambda i: (0, 0)),
            pl.BlockSpec((HIDDEN, LANE), lambda i: (0, 0)),
            pl.BlockSpec((1, LANE), lambda i: (0, 0)),
        ],
        out_specs=pl.BlockSpec((bt, LANE), lambda i: (i, 0)),
        compiler_params=pltpu.CompilerParams(
            dimension_semantics=("parallel",),  # megacore split on v7x
        ),
        cost_estimate=pl.CostEstimate(
            flops=flops, transcendentals=0, bytes_accessed=bytes_accessed),
    )(x_p, w1_b, b1_f, w2_b, b2_f)

    return out[:B, :d_out]


def init_dqn_params(key, input_dim, output_dim, hidden=HIDDEN):
    """Deterministic init mirroring nn.Linear's uniform(-1/sqrt(fan_in), +1/sqrt(fan_in)).
    Weights are stored transposed relative to PyTorch: (in_features, out_features)."""
    k1, k2, k3, k4 = jax.random.split(key, 4)
    bound1 = 1.0 / jnp.sqrt(jnp.float32(input_dim))
    bound2 = 1.0 / jnp.sqrt(jnp.float32(hidden))
    w1 = jax.random.uniform(k1, (input_dim, hidden), jnp.float32, -bound1, bound1)
    b1 = jax.random.uniform(k2, (1, hidden), jnp.float32, -bound1, bound1)
    w2 = jax.random.uniform(k3, (hidden, output_dim), jnp.float32, -bound2, bound2)
    b2 = jax.random.uniform(k4, (1, output_dim), jnp.float32, -bound2, bound2)
    return w1, b1, w2, b2


if __name__ == "__main__":
    key = jax.random.PRNGKey(0)
    k_in, k_params = jax.random.split(key)

    batch = 13        # deliberately not a multiple of 8 -> exercises pad + slice
    input_dim = 32    # observation vector size
    output_dim = 8    # number of discrete actions

    x = jax.random.normal(k_in, (batch, input_dim), jnp.float32)
    w1, b1, w2, b2 = init_dqn_params(k_params, input_dim, output_dim)

    # Pure f32 reference (same math as the PyTorch module).
    ref = jnp.maximum(x @ w1 + b1, 0.0) @ w2 + b2

    # Default tile (single grid step at this tiny batch).
    out = jax.block_until_ready(dqn_forward(x, w1, b1, w2, b2))
    assert out.shape == (batch, output_dim)
    assert jnp.allclose(out, ref, atol=3e-2, rtol=3e-2), "mismatch (default tile)"

    # Small tile -> multi-step batch grid, checks the pipelined path too.
    out_g = jax.block_until_ready(dqn_forward(x, w1, b1, w2, b2, block_b=8))
    assert out_g.shape == (batch, output_dim)
    assert jnp.allclose(out_g, ref, atol=3e-2, rtol=3e-2), "mismatch (gridded tile)"

    print("KERNEL_OK")
</pallas_src>

<mosaic_0001>
module attributes {stable_mosaic.version = 11 : i64} {
  func.func @dqn_kernel(%arg0: i32, %arg1: memref<16x32xbf16, #tpu.memory_space<vmem>>, %arg2: memref<32x128xbf16, #tpu.memory_space<vmem>>, %arg3: memref<1x128xf32, #tpu.memory_space<vmem>>, %arg4: memref<128x128xbf16, #tpu.memory_space<vmem>>, %arg5: memref<1x128xf32, #tpu.memory_space<vmem>>, %arg6: memref<16x128xf32, #tpu.memory_space<vmem>>) attributes {dimension_semantics = [#tpu.dimension_semantics<parallel>], iteration_bounds = array<i64: 1>, scalar_prefetch = 0 : i64, scratch_operands = 0 : i64, tpu.core_type = #tpu.core_type<tc>, window_params = [{transform_indices = @transform_0, window_bounds = array<i64: 16, 32>}, {pipeline_mode = #tpu.pipeline_mode<synchronous>, transform_indices = @transform_1, window_bounds = array<i64: 32, 128>}, {pipeline_mode = #tpu.pipeline_mode<synchronous>, transform_indices = @transform_2, window_bounds = array<i64: 1, 128>}, {pipeline_mode = #tpu.pipeline_mode<synchronous>, transform_indices = @transform_3, window_bounds = array<i64: 128, 128>}, {pipeline_mode = #tpu.pipeline_mode<synchronous>, transform_indices = @transform_4, window_bounds = array<i64: 1, 128>}, {transform_indices = @transform_5, window_bounds = array<i64: 16, 128>}]} {
    %c0 = arith.constant 0 : index
    %c0_0 = arith.constant 0 : index
    %0 = vector.load %arg1[%c0, %c0_0] : memref<16x32xbf16, #tpu.memory_space<vmem>>, vector<16x32xbf16>
    %c0_1 = arith.constant 0 : index
    %c0_2 = arith.constant 0 : index
    %1 = vector.load %arg2[%c0_1, %c0_2] : memref<32x128xbf16, #tpu.memory_space<vmem>>, vector<32x128xbf16>
    %cst = arith.constant dense<0.000000e+00> : vector<16x128xf32>
    %2 = tpu.matmul %0, %1, %cst {dimension_numbers = #tpu.dot_dimension_numbers<[1], [0], [0], [1], [0, 0, 1, 1], [], []>} : vector<16x32xbf16>, vector<32x128xbf16>, vector<16x128xf32> -> vector<16x128xf32>
    %c0_3 = arith.constant 0 : index
    %c0_4 = arith.constant 0 : index
    %3 = vector.load %arg3[%c0_3, %c0_4] : memref<1x128xf32, #tpu.memory_space<vmem>>, vector<1x128xf32>
    %4 = vector.broadcast %3 : vector<1x128xf32> to vector<16x128xf32>
    %5 = arith.addf %2, %4 : vector<16x128xf32>
    %cst_5 = arith.constant 0.000000e+00 : f32
    %6 = vector.broadcast %cst_5 : f32 to vector<16x128xf32>
    %7 = arith.maximumf %5, %6 : vector<16x128xf32>
    %8 = arith.truncf %7 : vector<16x128xf32> to vector<16x128xbf16>
    %c0_6 = arith.constant 0 : index
    %c0_7 = arith.constant 0 : index
    %9 = vector.load %arg4[%c0_6, %c0_7] : memref<128x128xbf16, #tpu.memory_space<vmem>>, vector<128x128xbf16>
    %cst_8 = arith.constant dense<0.000000e+00> : vector<16x128xf32>
    %10 = tpu.matmul %8, %9, %cst_8 {dimension_numbers = #tpu.dot_dimension_numbers<[1], [0], [0], [1], [0, 0, 1, 1], [], []>} : vector<16x128xbf16>, vector<128x128xbf16>, vector<16x128xf32> -> vector<16x128xf32>
    %c0_9 = arith.constant 0 : index
    %c0_10 = arith.constant 0 : index
    %11 = vector.load %arg5[%c0_9, %c0_10] : memref<1x128xf32, #tpu.memory_space<vmem>>, vector<1x128xf32>
    %12 = vector.broadcast %11 : vector<1x128xf32> to vector<16x128xf32>
    %13 = arith.addf %10, %12 : vector<16x128xf32>
    %c0_11 = arith.constant 0 : index
    %c0_12 = arith.constant 0 : index
    %14 = vector.load %arg6[%c0_11, %c0_12] : memref<16x128xf32, #tpu.memory_space<vmem>>, vector<16x128xf32>
    tpu.vector_store %arg6[%c0_11, %c0_12], %13 {strides = array<i32>} : memref<16x128xf32, #tpu.memory_space<vmem>>, vector<16x128xf32>,
    return
  }
  func.func @transform_0(%arg0: i32) -> (i32, i32) {
    %c0_i32 = arith.constant 0 : i32
    %c0_i32_0 = arith.constant 0 : i32
    return %arg0, %c0_i32 : i32, i32
  }
  func.func @transform_1(%arg0: i32) -> (i32, i32) {
    %c0_i32 = arith.constant 0 : i32
    %c0_i32_0 = arith.constant 0 : i32
    %c0_i32_1 = arith.constant 0 : i32
    return %c0_i32, %c0_i32_0 : i32, i32
  }
  func.func @transform_2(%arg0: i32) -> (i32, i32) {
    %c0_i32 = arith.constant 0 : i32
    %c0_i32_0 = arith.constant 0 : i32
    %c0_i32_1 = arith.constant 0 : i32
    return %c0_i32, %c0_i32_0 : i32, i32
  }
  func.func @transform_3(%arg0: i32) -> (i32, i32) {
    %c0_i32 = arith.constant 0 : i32
    %c0_i32_0 = arith.constant 0 : i32
    %c0_i32_1 = arith.constant 0 : i32
    return %c0_i32, %c0_i32_0 : i32, i32
  }
  func.func @transform_4(%arg0: i32) -> (i32, i32) {
    %c0_i32 = arith.constant 0 : i32
    %c0_i32_0 = arith.constant 0 : i32
    %c0_i32_1 = arith.constant 0 : i32
    return %c0_i32, %c0_i32_0 : i32, i32
  }
  func.func @transform_5(%arg0: i32) -> (i32, i32) {
    %c0_i32 = arith.constant 0 : i32
    %c0_i32_0 = arith.constant 0 : i32
    return %arg0, %c0_i32 : i32, i32
  }
}

</mosaic_0001>

<bundles_post_ra>
// kernel: dqn_forward.1
= control target key start
LH: loop header
LB: loop body
LE: loop exit
PB: predicated region body
PF: predicated region fallthrough
CT: control target
= control target key end

     0   :  { %v284_v0 = vmov 0.0   ;;  %vm285_vm0 = vmmov 0   ;;  %vm51_vm1 = vcmask 261120   ;;  %s361_s1 = inlined_call_operand.vmem [shape: bf16[32,128], index: 1, kind: input, shape index: {}]   ;;  %s362_s3 = inlined_call_operand.vmem [shape: bf16[128,128], index: 3, kind: input, shape index: {}]   ;;  %s363_s0 = inlined_call_operand.vmem [shape: bf16[16,32], index: 0, kind: input, shape index: {}]   ;;  %s364_s2 = inlined_call_operand.vmem [shape: f32[1,128], index: 2, kind: input, shape index: {}]   ;;  %s365_s4 = inlined_call_operand.vmem [shape: f32[1,128], index: 4, kind: input, shape index: {}]   ;;  %s366_s5 = inlined_call_operand.vmem [shape: f32[16,128], index: 5, kind: output, shape index: {}]  }
   0x1   :  { %243 = vmatprep.subr.bf16.mxu0 %v284_v0  ;;  %v273_v1 = vld [vmem:[%s361_s1 + $0x8] sm:$0xff]   ;;  %247 = vmatprep.mubr.msk.bf16.mxu0 %vm285_vm0, %v284_v0  ;;  %v274_v2 = vld [vmem:[%s361_s1] sm:$0xff]   ;;  %v276_v3 = vld [vmem:[%s362_s3 + $0x38] sm:$0xff]  }
   0x2   :  { %251 = vmatprep.subr.bf16.mxu1 %v284_v0  ;;  %267 = vmatprep.mubr.msk.bf16.mxu1 %vm285_vm0, %v284_v0  ;;  %v275_v4 = vld [vmem:[%s363_s0] sm:$0xff]   ;;  %v277_v5 = vld [vmem:[%s362_s3 + $0x30] sm:$0xff]   ;;  %v278_v6 = vld [vmem:[%s362_s3 + $0x28] sm:$0xff]  }
   0x3   :  { %244 = vmatpush3.bf16.msra.mxu0 %v273_v1  ;;  %252 = vmatpush3.bf16.msra.mxu1 %v276_v3  ;;  %v279_v7 = vld [vmem:[%s362_s3 + $0x20] sm:$0xff]   ;;  %v280_v8 = vld [vmem:[%s362_s3 + $0x18] sm:$0xff]   ;;  %v281_v9 = vld [vmem:[%s362_s3 + $0x10] sm:$0xff]  }
   0x4   :  { %245 = vmatprep.subr.bf16.mxu0 %v284_v0  ;;  %253 = vmatprep.subr.bf16.mxu1 %v284_v0  ;;  %v282_v10 = vld [vmem:[%s362_s3 + $0x8] sm:$0xff]   ;;  %v283_v11 = vld [vmem:[%s362_s3] sm:$0xff]  }
   0x5   :  { %v217_v12 = vld [vmem:[%s364_s2] ss:$0 sm:$0xff] }
   0x6   :  { %v222_v22 = vld [vmem:[%s365_s4] ss:$0 sm:$0xff] }
   0x7   :  { %246 = vmatpush3.bf16.msra.mxu0 %v274_v2  ;;  %254 = vmatpush3.bf16.msra.mxu1 %v277_v5 }
   0x8   :  { %255 = vmatprep.subr.bf16.mxu1 %v284_v0 }
   0xa   :  { %248 = vmatmul.mubr.msk.bf16.vlgmr.msra.gmra.mxu0 %vm51_vm1, %v275_v4 }
   0xb   :  { %256 = vmatpush3.bf16.msra.mxu1 %v278_v6 }
   0xc   :  { %257 = vmatprep.subr.bf16.mxu1 %v284_v0 }
   0xf   :  { %258 = vmatpush3.bf16.msra.mxu1 %v279_v7 }
  0x10   :  { %259 = vmatprep.subr.bf16.mxu1 %v284_v0 }
  0x13   :  { %260 = vmatpush3.bf16.msra.mxu1 %v280_v8 }
  0x14   :  { %261 = vmatprep.subr.bf16.mxu1 %v284_v0 }
  0x17   :  { %262 = vmatpush3.bf16.msra.mxu1 %v281_v9 }
  0x18   :  { %263 = vmatprep.subr.bf16.mxu1 %v284_v0 }
  0x1b   :  { %264 = vmatpush3.bf16.msra.mxu1 %v282_v10 }
  0x1c   :  { %265 = vmatprep.subr.bf16.mxu1 %v284_v0 }
  0x1f   :  { %266 = vmatpush3.bf16.msra.mxu1 %v283_v11 }
  0xca   :  { %v89_v13 = vpop.f32.mrf.mxu0 }
  0xcb   :  { %v90_v15 = vadd.f32 %v217_v12, %v89_v13 }
  0xcc   :  { %v249_v14 = vpop.f32.mrf.mxu0 }
  0xcd   :  { %v96_v19 = vmax.f32 %v90_v15, 0.0 }
  0xce   :  { %v92_v16 = vpop.f32.mrf.mxu0 }
  0xcf   :  { %v93_v17 = vadd.f32 %v217_v12, %v92_v16 }
  0xd0   :  { %v250_v18 = vpop.f32.mrf.mxu0 }
  0xd1   :  { %v97_v20 = vmax.f32 %v93_v17, 0.0 }
  0xd3   :  { %v98_v21 = vpack.c.bf16 %v97_v20, %v96_v19 }
  0xd5   :  { %268 = vmatmul.mubr.bf16.vlgmr.msra.gmra.mxu1 %v98_v21 }
 0x195   :  { %v204_v23 = vpop.f32.mrf.mxu1 }
 0x196   :  { %v205_v24 = vadd.f32 %v222_v22, %v204_v23 }
 0x197   :  { %v269_v25 = vpop.f32.mrf.mxu1 }
 0x198   :  { %211 = vst [vmem:[%s366_s5] sm:$0xff] %v205_v24 }
 0x199   :  { %v207_v26 = vpop.f32.mrf.mxu1 }
 0x19a   :  { %v208_v27 = vadd.f32 %v222_v22, %v207_v26 }
 0x19b   :  { %v270_v28 = vpop.f32.mrf.mxu1 }
 0x19c   :  { %212 = vst [vmem:[%s366_s5 + $0x8] sm:$0xff] %v208_v27 }

</bundles_post_ra>
